<compile_context>
chip_gen: v7x
topology: tpu7x:2x2x1
jax: 0.10.0
libtpu: 0.0.40
codegen_flags: <defaults>
</compile_context>

<pallas_src>
import functools

import jax
import jax.numpy as jnp
from jax.experimental import pallas as pl
from jax.experimental.pallas import tpu as pltpu

all_nonlinear = ['relu', 'tanh', 'softplus', 'sigmoid', 'softmax']
all_wo_softmax = ['relu', 'tanh', 'softplus', 'sigmoid']
bounded_nonlinear = ['sigmoid', 'softmax']
common_nonlinear = ['relu', 'sigmoid']
positive_nonlinear = ['relu', 'softplus', 'sigmoid', 'softmax']
positive_nonlinear_wo_softmax = ['relu', 'softplus', 'sigmoid']
positive_nonlinear_wo_softplus = ['relu', 'softplus', 'sigmoid', 'softmax']
unbounded_nonlinear = ['relu', 'tanh', 'softplus']

_MiB = 1024 * 1024
# Lane-dense widths (multiples of 128) tried, largest first, for the free reshape.
_LANE_CANDIDATES = (2048, 1024, 512, 256, 128)


def _round_up(x: int, m: int) -> int:
    return (x + m - 1) // m * m


def _vmem_capacity_bytes() -> int:
    """Physical VMEM per TensorCore (128 MiB on v5e/v6e, 64 MiB on v7x)."""
    try:
        return int(pltpu.get_tpu_info().vmem_capacity_bytes)
    except Exception:
        return 64 * _MiB  # conservative fallback (v7x-sized)


def _budgets():
    """Per-generation (elementwise block, softmax block, vmem_limit) byte budgets."""
    cap = _vmem_capacity_bytes()
    elem_blk = min(max(cap // 16, 4 * _MiB), 16 * _MiB)   # 8 MiB (v5e/v6e) / 4 MiB (v7x)
    smax_blk = min(max(cap // 32, 1 * _MiB), 4 * _MiB)    # 4 MiB (v5e/v6e) / 2 MiB (v7x)
    vmem_lim = min(max(cap // 2, 32 * _MiB), 96 * _MiB)   # 64 MiB (v5e/v6e) / 32 MiB (v7x)
    return elem_blk, smax_blk, vmem_lim


# ---------------------------------------------------------------------------
# Pallas kernels
# ---------------------------------------------------------------------------
def _elemwise_kernel(x_ref, o_ref, *, non_linear, scale, value_clip):
    """Elementwise nonlinearity + optional scale + optional clamp_max on a VMEM tile."""
    x = x_ref[...]
    if non_linear == 'relu':
        # Exact in the native dtype; no upcast needed (halves vreg pressure for bf16).
        y = jnp.maximum(x, jnp.zeros((), x.dtype))
    else:
        # bf16 VPU/EUP are native on v6e/v7x (Mosaic converts on v5e); other dtypes
        # go through f32.  Matches PyTorch's native-dtype compute for bf16 tensors.
        cdt = x.dtype if x.dtype in (jnp.bfloat16, jnp.float32) else jnp.float32
        xf = x.astype(cdt)
        if non_linear == 'tanh':
            y = jnp.tanh(xf)
        elif non_linear == 'softplus':
            y = jnp.logaddexp(xf, jnp.zeros((), cdt))
        elif non_linear == 'sigmoid':
            y = jax.nn.sigmoid(xf)
        else:
            raise ValueError(f'bad non_linear for elementwise kernel: {non_linear}')
    if scale != 1.0:
        y = y * jnp.asarray(scale, dtype=y.dtype)
    if value_clip is not None:
        y = jnp.minimum(y, jnp.asarray(value_clip, dtype=y.dtype))
    o_ref[...] = y.astype(o_ref.dtype)


def _softmax_kernel(x_ref, o_ref):
    """Softmax over axis 1 (speaker axis S) of a (1, S, TILE_FT) VMEM tile."""
    x = x_ref[...].astype(jnp.float32)
    m = jnp.max(x, axis=1, keepdims=True)
    e = jnp.exp(x - m)
    s = jnp.sum(e, axis=1, keepdims=True)
    # Exact reciprocal keeps bit-level parity with jax.nn.softmax; the kernel is
    # HBM-bound, so approx=True (raw EUP vrcp) would not change wall-clock anyway.
    inv = pl.reciprocal(s, approx=False)
    o_ref[...] = (e * inv).astype(o_ref.dtype)


# ---------------------------------------------------------------------------
# Wrappers calling pallas_call
# ---------------------------------------------------------------------------
def _elemwise_pallas(x, non_linear, scale, value_clip):
    elem_blk, _, vmem_lim = _budgets()
    orig_shape = x.shape
    total = x.size
    itemsize = jnp.dtype(x.dtype).itemsize
    sublane = max(8, 32 // itemsize)  # dtype sublane packing: f32->8, bf16->16, i8->32

    # Copy-free 2D view.  Preferred: lane-dense (rows, lane) with lane a large
    # multiple of 128 dividing the element count (unmasked full-width stores).
    lane = next((c for c in _LANE_CANDIDATES if total % c == 0), None)
    if lane is not None:
        x2d = x.reshape(total // lane, lane)
    else:
        # Fallback: (prod(leading), last_dim) — still no pad/copy; stores may be
        # partially masked when last_dim % 128 != 0, but HBM traffic stays minimal.
        lane = orig_shape[-1]
        x2d = x.reshape(-1, lane)
    rows = x2d.shape[0]

    # Row tile: multiple of the sublane packing, sized so one block ~= elem_blk bytes.
    tr_cap = max(sublane, (elem_blk // (lane * itemsize)) // sublane * sublane)
    tr = min(tr_cap, _round_up(rows, sublane))
    grid = (pl.cdiv(rows, tr),)  # ragged last block: OOB reads discarded, writes masked

    kernel = functools.partial(
        _elemwise_kernel,
        non_linear=non_linear,
        scale=float(scale),
        value_clip=None if value_clip is None else float(value_clip),
    )

    # TODO(synk): on v7x, consider pltpu.CORE_PARALLEL if the packer keeps this
    # 1-D "parallel" grid on a single TensorCore.
    out2d = pl.pallas_call(
        kernel,
        out_shape=jax.ShapeDtypeStruct((rows, lane), x.dtype),
        grid_spec=pltpu.PrefetchScalarGridSpec(
            num_scalar_prefetch=0,
            grid=grid,
            in_specs=[pl.BlockSpec((tr, lane), lambda i: (i, 0))],
            out_specs=pl.BlockSpec((tr, lane), lambda i: (i, 0)),
        ),
        compiler_params=pltpu.CompilerParams(
            dimension_semantics=("parallel",),
            vmem_limit_bytes=vmem_lim),
    )(x2d)

    return out2d.reshape(orig_shape)


def _softmax_pallas(x, dim):
    if x.ndim != 4:
        raise RuntimeError(
            f'MaskNonLinear (softmax) expects 4D tensor, got {x.ndim}')
    _, smax_blk, vmem_lim = _budgets()
    dim = dim % 4
    # For dim == 1 (the speaker-axis convention used for mask estimation) this
    # moveaxis is free.  For other dims it costs two HBM transpose passes.
    # TODO(synk): handle non-default softmax dims in-kernel to avoid the transposes.
    x_m = jnp.moveaxis(x, dim, 1)
    n, S, F, T = x_m.shape
    FT = F * T
    x3 = x_m.reshape(n, S, FT)

    # Working set per lane column is ~round_up(S, 8) sublane-padded f32 rows
    # (input upcast + exp + output), independent of the input dtype — size the
    # lane tile off that so small-S blocks don't blow the v7x scoped VMEM limit.
    s_rows = _round_up(S, 8)
    if FT <= 128:
        tile_ft = FT  # full (possibly non-128-multiple) last dim is always legal
    else:
        cap = max(128, (smax_blk // (s_rows * 4)) // 128 * 128)
        tile_ft = min(cap, _round_up(FT, 128))
    # Ragged last block: OOB lanes read garbage but columns are independent under
    # the S-axis softmax, and OOB writes are masked — no padding pass needed.
    grid = (n, pl.cdiv(FT, tile_ft))

    out3 = pl.pallas_call(
        _softmax_kernel,
        out_shape=jax.ShapeDtypeStruct((n, S, FT), x.dtype),
        grid_spec=pltpu.PrefetchScalarGridSpec(
            num_scalar_prefetch=0,
            grid=grid,
            in_specs=[pl.BlockSpec((1, S, tile_ft), lambda b, j: (b, 0, j))],
            out_specs=pl.BlockSpec((1, S, tile_ft), lambda b, j: (b, 0, j)),
        ),
        compiler_params=pltpu.CompilerParams(
            dimension_semantics=("parallel", "parallel"),
            vmem_limit_bytes=vmem_lim),
    )(x3)

    out_m = out3.reshape(n, S, F, T)
    return jnp.moveaxis(out_m, 1, dim)


class MaskNonLinear:
    """JAX/Pallas port of aps.sse.base.MaskNonLinear (no trainable params)."""

    def __init__(self, non_linear: str, enable: str = 'all',
                 scale: float = 1, value_clip=None) -> None:
        supported_set = {
            'positive': positive_nonlinear,
            'positive_wo_softmax': positive_nonlinear_wo_softmax,
            'positive_wo_softplus': positive_nonlinear_wo_softplus,
            'all': all_nonlinear,
            'all_wo_softmax': all_wo_softmax,
            'bounded': bounded_nonlinear,
            'unbounded': unbounded_nonlinear,
            'common': common_nonlinear,
        }
        if non_linear not in supported_set[enable]:
            raise ValueError(f'Unsupported nonlinear: {non_linear}')
        self.non_linear = non_linear
        self.scale = scale
        self.value_clip = value_clip

    def __call__(self, inp, **kwargs):
        if inp.ndim not in [3, 4]:
            raise RuntimeError(
                f'MaskNonLinear expects 3/4D tensor, got {inp.ndim}')
        if self.non_linear == 'softmax':
            if inp.ndim != 4:
                raise RuntimeError(
                    f'MaskNonLinear (softmax) expects 4D tensor, got {inp.ndim}')
            # th.softmax(inp, **kwargs) — scale/value_clip are NOT applied on the
            # softmax path (matches the PyTorch reference).
            dim = kwargs.get('dim', 1)
            return _softmax_pallas(inp, dim)
        # elementwise nonlinearities: scale + optional clamp_max applied in-kernel
        return _elemwise_pallas(inp, self.non_linear, self.scale,
                                self.value_clip)


# ---------------------------------------------------------------------------
# Demo / self-check
# ---------------------------------------------------------------------------
if __name__ == "__main__":
    key = jax.random.PRNGKey(0)
    k1, k2, k3, k4 = jax.random.split(key, 4)

    # 3D input: N x F x T (total is a multiple of 128 -> lane-dense path, no copy)
    x3d = jax.random.normal(k1, (2, 16, 32), dtype=jnp.float32)
    # 3D input, larger lane-dense case
    x3d_big = jax.random.normal(k2, (2, 16, 256), dtype=jnp.float32)
    # 3D input with awkward sizes (total % 128 != 0) -> copy-free fallback + ragged grid
    x3d_odd = jax.random.normal(k4, (2, 5, 7), dtype=jnp.float32)
    # 4D input: N x S x F x T
    x4d = jax.random.normal(k3, (2, 4, 16, 16), dtype=jnp.float32)

    # sigmoid with scale + value_clip
    m_sig = MaskNonLinear('sigmoid', enable='common', scale=2.0, value_clip=1.5)
    y_sig = jax.block_until_ready(m_sig(x3d))
    ref_sig = jnp.minimum(jax.nn.sigmoid(x3d) * 2.0, 1.5)
    assert y_sig.shape == x3d.shape
    assert jnp.allclose(y_sig, ref_sig, atol=1e-5), "sigmoid mismatch"

    # relu (native-dtype path)
    m_relu = MaskNonLinear('relu', enable='common')
    y_relu = jax.block_until_ready(m_relu(x3d_big))
    assert jnp.allclose(y_relu, jnp.maximum(x3d_big, 0.0), atol=1e-6), "relu mismatch"

    # softplus (unbounded) on an awkward shape (exercises the no-pad fallback path)
    m_sp = MaskNonLinear('softplus', enable='unbounded')
    y_sp = jax.block_until_ready(m_sp(x3d_odd))
    assert y_sp.shape == x3d_odd.shape
    assert jnp.allclose(y_sp, jax.nn.softplus(x3d_odd), atol=1e-5), "softplus mismatch"

    # tanh on a 4D tensor (elementwise path is rank-agnostic)
    m_tanh = MaskNonLinear('tanh', enable='all_wo_softmax')
    y_tanh = jax.block_until_ready(m_tanh(x4d))
    assert jnp.allclose(y_tanh, jnp.tanh(x4d), atol=1e-5), "tanh mismatch"

    # softmax over the speaker axis (dim=1), 4D only
    m_sm = MaskNonLinear('softmax', enable='positive')
    y_sm = jax.block_until_ready(m_sm(x4d, dim=1))
    ref_sm = jax.nn.softmax(x4d, axis=1)
    assert y_sm.shape == x4d.shape
    assert jnp.allclose(y_sm, ref_sm, atol=1e-5), "softmax mismatch"
    assert jnp.allclose(jnp.sum(y_sm, axis=1), 1.0, atol=1e-5)

    print("KERNEL_OK")
</pallas_src>

<mosaic_0001>
module attributes {stable_mosaic.version = 11 : i64} {
  func.func @_elemwise_kernel(%arg0: i32, %arg1: memref<8x1024xf32, #tpu.memory_space<vmem>>, %arg2: memref<8x1024xf32, #tpu.memory_space<vmem>>) attributes {dimension_semantics = [#tpu.dimension_semantics<parallel>], iteration_bounds = array<i64: 1>, scalar_prefetch = 0 : i64, scratch_operands = 0 : i64, tpu.core_type = #tpu.core_type<tc>, window_params = [{transform_indices = @transform_0, window_bounds = array<i64: 8, 1024>}, {transform_indices = @transform_1, window_bounds = array<i64: 8, 1024>}]} {
    %c0 = arith.constant 0 : index
    %c0_0 = arith.constant 0 : index
    %0 = vector.load %arg1[%c0, %c0_0] : memref<8x1024xf32, #tpu.memory_space<vmem>>, vector<8x1024xf32>
    %1 = arith.negf %0 : vector<8x1024xf32>
    %2 = math.exp %1 : vector<8x1024xf32>
    %cst = arith.constant 1.000000e+00 : f32
    %3 = vector.broadcast %cst : f32 to vector<8x1024xf32>
    %4 = arith.addf %3, %2 : vector<8x1024xf32>
    %5 = arith.divf %3, %4 : vector<8x1024xf32>
    %cst_1 = arith.constant 2.000000e+00 : f32
    %6 = vector.broadcast %cst_1 : f32 to vector<8x1024xf32>
    %7 = arith.mulf %5, %6 : vector<8x1024xf32>
    %cst_2 = arith.constant 1.500000e+00 : f32
    %8 = vector.broadcast %cst_2 : f32 to vector<8x1024xf32>
    %9 = arith.minimumf %7, %8 : vector<8x1024xf32>
    %c0_3 = arith.constant 0 : index
    %c0_4 = arith.constant 0 : index
    %10 = vector.load %arg2[%c0_3, %c0_4] : memref<8x1024xf32, #tpu.memory_space<vmem>>, vector<8x1024xf32>
    tpu.vector_store %arg2[%c0_3, %c0_4], %9 {strides = array<i32>} : memref<8x1024xf32, #tpu.memory_space<vmem>>, vector<8x1024xf32>,
    return
  }
  func.func @transform_0(%arg0: i32) -> (i32, i32) {
    %c0_i32 = arith.constant 0 : i32
    %c0_i32_0 = arith.constant 0 : i32
    return %arg0, %c0_i32 : i32, i32
  }
  func.func @transform_1(%arg0: i32) -> (i32, i32) {
    %c0_i32 = arith.constant 0 : i32
    %c0_i32_0 = arith.constant 0 : i32
    return %arg0, %c0_i32 : i32, i32
  }
}

</mosaic_0001>

<bundles_post_ra>
// kernel: tpu_custom_call.1
= control target key start
LH: loop header
LB: loop body
LE: loop exit
PB: predicated region body
PF: predicated region fallthrough
CT: control target
= control target key end

     0   :  { %6 = vsyncpa [#allocation3], 0  ;;  %s256_s0 = inlined_call_operand.hbm [shape: f32[1,1024], index: 0, kind: input, shape index: {}]   ;;  %s257_s1 = inlined_call_operand.hbm [shape: f32[1,1024], index: 1, kind: output, shape index: {}]  }
   0x1   :  { %7 = vsyncpa [#allocation4], 0 }
   0x2   :  { %12 = vsyncadd [#allocation3], 896  ;;  %s212_s6 = smov [#allocation2]   ;;  %s164_s10 = scalar_lea.hbm %s256_s0, 128 }
   0x3   :  { %s13_s7 = sshll.u32 %s212_s6, 4  ;;  %p165_p0 = scmp.ne.s32.totalorder %s256_s0, %s164_s10  ;;  %s14_s7 = int_to_ptr.vmem [resolvable:$true] %s13_s7 }
   0x4   :  { %p168_p1 = scmp.lt.u32.totalorder %s164_s10, %s256_s0 }
   0x6   :  { %p170_p2 = pnand %p168_p1, %p165_p0 }
   0x8   :  { %173 = shalt.err (!%p170_p2)
}
   0x9   :  { %s174_s15 = scalar_lea.vmem %s14_s7, 128  ;;  %s178_s16 = scalar_lea.vmem %s14_s7, 1024 }
   0xa   :  { %p175_p3 = scmp.ne.s32.totalorder %s14_s7, %s174_s15  ;;  %p179_p4 = scmp.lt.s32.totalorder %s14_s7, %s14_s7 }
   0xb   :  { %p180_p5 = scmp.lt.s32.totalorder %s178_s16, %s174_s15 }
   0xd   :  { %p181_p6 = por %p180_p5, %p179_p4 }
   0xf   :  { %p182_p7 = pnand %p181_p6, %p175_p3 }
  0x11   :  { %185 = shalt.err (!%p182_p7)
}
  0x12   :  { %s213_s17 = smov 128   ;;  %s214_s18 = smov 8  }
  0x13   :  { %19 = dma.hbm_to_vmem [thread:$0]  %s256_s0, 128, %s14_s7, [#allocation3], %s213_s17, %s213_s17, %s214_s18  }
  0x14   :  { %208 = dma.done.wait [#allocation3], 1024  }
  0x15   :  { %209 = vsyncadd [#allocation3], 4294966272  ;;  %v23_v0 = vld [vmem:[#allocation2] sm:$0xff]  ;;  %v24_v1 = vld [vmem:[#allocation2 + $0x8] sm:$0xff] }
  0x16   :  { %v25_v2 = vld [vmem:[#allocation2 + $0x10] sm:$0xff]  ;;  %v120_v3 = vmul.f32 -1.442695, %v23_v0  ;;  %v121_v4 = vmul.f32 -1.442695, %v24_v1  ;;  %v26_v6 = vld [vmem:[#allocation2 + $0x18] sm:$0xff] }
  0x17   :  { %v122_v5 = vmul.f32 -1.442695, %v25_v2  ;;  %v27_v7 = vld [vmem:[#allocation2 + $0x20] sm:$0xff]  ;;  %v28_v8 = vld [vmem:[#allocation2 + $0x28] sm:$0xff]  ;;  %v123_v9 = vmul.f32 -1.442695, %v26_v6 }
  0x18   :  { %132 = vpow2.f32 %v120_v3  ;;  %v124_v10 = vmul.f32 -1.442695, %v27_v7  ;;  %v125_v11 = vmul.f32 -1.442695, %v28_v8  ;;  %v29_v12 = vld [vmem:[#allocation2 + $0x30] sm:$0xff]  ;;  %v30_v13 = vld [vmem:[#allocation2 + $0x38] sm:$0xff] }
  0x19   :  { %134 = vpow2.f32 %v121_v4  ;;  %v126_v14 = vmul.f32 -1.442695, %v29_v12  ;;  %v127_v15 = vmul.f32 -1.442695, %v30_v13 }
  0x1a   :  { %136 = vpow2.f32 %v122_v5 }
  0x1b   :  { %138 = vpow2.f32 %v123_v9 }
  0x1c   :  { %140 = vpow2.f32 %v124_v10 }
  0x1d   :  { %142 = vpow2.f32 %v125_v11 }
  0x1e   :  { %144 = vpow2.f32 %v126_v14 }
  0x1f   :  { %146 = vpow2.f32 %v127_v15 }
  0x22   :  { %v133_v16 = vpop.eup %132 }
  0x23   :  { %v135_v17 = vpop.eup %134  ;;  %v55_v18 = vadd.f32 1.0, %v133_v16 }
  0x24   :  { %v137_v19 = vpop.eup %136  ;;  %v56_v20 = vadd.f32 1.0, %v135_v17 }
  0x25   :  { %v139_v21 = vpop.eup %138  ;;  %148 = vrcp.f32 %v55_v18  ;;  %v57_v22 = vadd.f32 1.0, %v137_v19 }
  0x26   :  { %v141_v23 = vpop.eup %140  ;;  %150 = vrcp.f32 %v56_v20  ;;  %v58_v24 = vadd.f32 1.0, %v139_v21 }
  0x27   :  { %v143_v25 = vpop.eup %142  ;;  %152 = vrcp.f32 %v57_v22  ;;  %v59_v26 = vadd.f32 1.0, %v141_v23 }
  0x28   :  { %v145_v27 = vpop.eup %144  ;;  %154 = vrcp.f32 %v58_v24  ;;  %v60_v28 = vadd.f32 1.0, %v143_v25 }
  0x29   :  { %v147_v29 = vpop.eup %146  ;;  %156 = vrcp.f32 %v59_v26  ;;  %v61_v30 = vadd.f32 1.0, %v145_v27 }
  0x2a   :  { %158 = vrcp.f32 %v60_v28  ;;  %v62_v31 = vadd.f32 1.0, %v147_v29 }
  0x2b   :  { %160 = vrcp.f32 %v61_v30 }
  0x2c   :  { %162 = vrcp.f32 %v62_v31 }
  0x2f   :  { %v149_v32 = vpop.eup %148 }
  0x30   :  { %v151_v33 = vpop.eup %150  ;;  %v79_v34 = vmul.f32 2.0, %v149_v32 }
  0x31   :  { %v153_v35 = vpop.eup %152  ;;  %v80_v36 = vmul.f32 2.0, %v151_v33 }
  0x32   :  { %v155_v37 = vpop.eup %154  ;;  %v87_v38 = vmin.f32 %v79_v34, 1.5  ;;  %v81_v39 = vmul.f32 2.0, %v153_v35 }
  0x33   :  { %v157_v40 = vpop.eup %156  ;;  %v88_v41 = vmin.f32 %v80_v36, 1.5  ;;  %v82_v42 = vmul.f32 2.0, %v155_v37 }
  0x34   :  { %v159_v43 = vpop.eup %158  ;;  %95 = vst [vmem:[#allocation5] sm:$0xff] %v87_v38  ;;  %v89_v44 = vmin.f32 %v81_v39, 1.5  ;;  %v83_v45 = vmul.f32 2.0, %v157_v40 }
  0x35   :  { %v161_v46 = vpop.eup %160  ;;  %96 = vst [vmem:[#allocation5 + $0x8] sm:$0xff] %v88_v41  ;;  %v90_v47 = vmin.f32 %v82_v42, 1.5  ;;  %v84_v48 = vmul.f32 2.0, %v159_v43 }
  0x36   :  { %v163_v49 = vpop.eup %162  ;;  %97 = vst [vmem:[#allocation5 + $0x10] sm:$0xff] %v89_v44  ;;  %v91_v50 = vmin.f32 %v83_v45, 1.5  ;;  %v85_v51 = vmul.f32 2.0, %v161_v46 }
  0x37   :  { %98 = vst [vmem:[#allocation5 + $0x18] sm:$0xff] %v90_v47  ;;  %v92_v52 = vmin.f32 %v84_v48, 1.5  ;;  %v86_v53 = vmul.f32 2.0, %v163_v49 }
  0x38   :  { %99 = vst [vmem:[#allocation5 + $0x20] sm:$0xff] %v91_v50  ;;  %v93_v54 = vmin.f32 %v85_v51, 1.5 }
  0x39   :  { %100 = vst [vmem:[#allocation5 + $0x28] sm:$0xff] %v92_v52  ;;  %v94_v55 = vmin.f32 %v86_v53, 1.5 }
  0x3a   :  { %101 = vst [vmem:[#allocation5 + $0x30] sm:$0xff] %v93_v54 }
  0x3b   :  { %102 = vst [vmem:[#allocation5 + $0x38] sm:$0xff] %v94_v55 }
  0x3c   :  { %107 = vsyncadd [#allocation4], 896  ;;  %s215_s0 = smov [#allocation5]  }
  0x3d   :  { %s108_s21 = sshll.u32 %s215_s0, 4  ;;  %s109_s21 = int_to_ptr.vmem [resolvable:$true] %s108_s21 }
  0x3e   :  { %s186_s22 = scalar_lea.vmem %s109_s21, 128  ;;  %s190_s23 = scalar_lea.vmem %s109_s21, 1024 }
  0x3f   :  { %p187_p8 = scmp.ne.s32.totalorder %s109_s21, %s186_s22  ;;  %p191_p9 = scmp.lt.s32.totalorder %s109_s21, %s109_s21 }
  0x40   :  { %p192_p10 = scmp.lt.s32.totalorder %s190_s23, %s186_s22 }
  0x42   :  { %p193_p11 = por %p192_p10, %p191_p9 }
  0x44   :  { %p194_p12 = pnand %p193_p11, %p187_p8 }
  0x46   :  { %197 = shalt.err (!%p194_p12)
}
  0x47   :  { %s198_s26 = scalar_lea.hbm %s257_s1, 128 }
  0x48   :  { %p199_p13 = scmp.ne.s32.totalorder %s257_s1, %s198_s26  ;;  %p202_p0 = scmp.lt.u32.totalorder %s198_s26, %s257_s1 }
  0x4a   :  { %p204_p1 = pnand %p202_p0, %p199_p13 }
  0x4c   :  { %207 = shalt.err (!%p204_p1)
}
  0x4d   :  { %114 = dma.vmem_to_hbm [thread:$0]  %s109_s21, 128, %s257_s1, [#allocation4], %s213_s17, %s213_s17, %s214_s18  }
  0x4e   :  { %210 = dma.done.wait [#allocation4], 1024  }
  0x4f   :  { %211 = vsyncadd [#allocation4], 4294966272 }
  0x50   :  { %118 = vsyncpa [#allocation3], 1 }
  0x51   :  { %119 = vsyncpa [#allocation4], 1 }

</bundles_post_ra>
